<compile_context>
chip_gen: v5e
topology: v5e:2x2
jax: 0.10.0
libtpu: 0.0.40
codegen_flags: <defaults>
</compile_context>

<pallas_src>
import jax
import jax.numpy as jnp
from jax import lax
from jax.experimental import pallas as pl
from jax.experimental.pallas import tpu as pltpu

# Inner sub-chunk of batch lanes: [32, 512] f32 intermediates = 16 vregs each,
# which keeps the unrolled inner loop well inside the 64-vreg budget.
_LANE_CHUNK = 512


def _make_mlp_kernel(n_chunks, chunk):
    """Kernel specialised on the (static) inner chunking of one batch block."""

    def kernel(x_ref, w1_ref, b1_ref, w2_ref, b2_ref, w3_ref, b3_ref, oT_ref):
        def mlp_chunk(x_c):
            # fc1: contract the feature dims of W1 [32,4] and x_c [chunk,4]
            # (q @ k.T pattern) -> [32, chunk]; batch ends up on the lane axis.
            h = lax.dot_general(w1_ref[...], x_c, (((1,), (1,)), ((), ())),
                                preferred_element_type=jnp.float32)
            h = jnp.maximum(h + b1_ref[...], 0.0).astype(w2_ref.dtype)
            # fc2: [32,32] @ [32,chunk] -> [32,chunk]
            h = jnp.dot(w2_ref[...], h, preferred_element_type=jnp.float32)
            h = jnp.maximum(h + b2_ref[...], 0.0).astype(w3_ref.dtype)
            # fc3: [3,32] @ [32,chunk] -> [3,chunk]  (logits, f32)
            return jnp.dot(w3_ref[...], h,
                           preferred_element_type=jnp.float32) + b3_ref[...]

        if n_chunks == 1:
            oT_ref[...] = mlp_chunk(x_ref[...]).astype(oT_ref.dtype)
        else:
            def body(c, carry):
                r0 = pl.multiple_of(c * chunk, chunk)
                o = mlp_chunk(x_ref[pl.ds(r0, chunk), :])
                oT_ref[:, pl.ds(r0, chunk)] = o.astype(oT_ref.dtype)
                return carry

            # Fully unrolled so the LLO scheduler can overlap MXU / VPU / store
            # work across chunks while bounding per-iteration live ranges.
            lax.fori_loop(0, n_chunks, body, 0, unroll=True)

    return kernel


def _choose_blocking(B, block_rows):
    """Returns (block_rows_per_step, n_chunks_per_step, n_grid_steps)."""
    if B <= _LANE_CHUNK:
        # One full-array block (legal for any B since block dims == array dims).
        return B, 1, 1
    total_chunks = -(-B // _LANE_CHUNK)
    chunks_per_block = max(1, min(block_rows // _LANE_CHUNK, total_chunks))
    n_blocks = -(-total_chunks // chunks_per_block)
    if n_blocks == 1 and total_chunks >= 2:
        # Guarantee >=2 grid steps so v7x can shard the batch over both TCs.
        chunks_per_block = -(-total_chunks // 2)
        n_blocks = -(-total_chunks // chunks_per_block)
    return chunks_per_block * _LANE_CHUNK, chunks_per_block, n_blocks


def inv_dynamics_forward(x, params, *, block_rows=8192, return_transposed=False):
    """Forward pass of InvDynamicsNetwork as a single Pallas kernel.

    x: [B, 4] (f32, or bf16 if the cast is fused into x's producer upstream).
    params: PyTorch-native layout -- w1[32,4], b1[32], w2[32,32], b2[32],
            w3[3,32], b3[3].
    Returns [B, 3] f32 logits, or the lane-dense [3, B] layout (no extra HBM
    transpose pass) when return_transposed=True.
    """
    B, D_in = x.shape
    assert D_in == 4
    cdt = x.dtype  # MXU operand dtype; weights follow x's dtype (tiny cast).

    w1 = params["w1"].astype(cdt)
    w2 = params["w2"].astype(cdt)
    w3 = params["w3"].astype(cdt)
    b1 = params["b1"].reshape(-1, 1).astype(jnp.float32)
    b2 = params["b2"].reshape(-1, 1).astype(jnp.float32)
    b3 = params["b3"].reshape(-1, 1).astype(jnp.float32)

    block, n_chunks, n_blocks = _choose_blocking(B, block_rows)
    chunk = block if n_chunks == 1 else _LANE_CHUNK

    # Constant index_map => weight/bias blocks DMA'd once, VMEM-resident.
    const = lambda a: pl.BlockSpec(a.shape, lambda i: (0, 0))

    # Per-step VMEM footprint (x block lane-pads 4 -> 128; out sublane-pads
    # 3 -> 8), double-buffered by the pipeline.  Sized to stay well under the
    # v7x 64 MiB physical / 32 MiB default-scoped VMEM.
    x_itemsize = jnp.dtype(cdt).itemsize
    block_vmem = block * 128 * x_itemsize + 8 * block * 4
    vmem_limit = int(min(64 << 20, max(32 << 20, 2 * block_vmem + (8 << 20))))

    cost = pl.CostEstimate(
        flops=2 * B * (4 * 32 + 32 * 32 + 32 * 3),
        transcendentals=0,
        bytes_accessed=B * 4 * x_itemsize + B * 3 * 4
        + sum(a.size * a.dtype.itemsize for a in (w1, w2, w3, b1, b2, b3)),
    )

    oT = pl.pallas_call(
        _make_mlp_kernel(n_chunks, chunk),
        out_shape=jax.ShapeDtypeStruct((3, B), jnp.float32),
        grid_spec=pltpu.PrefetchScalarGridSpec(
            num_scalar_prefetch=0,
            grid=(n_blocks,),
            in_specs=[
                # Contiguous [block, 4] slab of x straight from HBM; the last
                # block may be partial (Pallas masks it).
                pl.BlockSpec((block, 4), lambda i: (i, 0)),
                const(w1), const(b1),
                const(w2), const(b2),
                const(w3), const(b3),
            ],
            out_specs=pl.BlockSpec((3, block), lambda i: (0, i)),
        ),
        compiler_params=pltpu.CompilerParams(
            dimension_semantics=("parallel",),   # batch steps shard across TCs (v7x)
            vmem_limit_bytes=vmem_limit,
        ),
        cost_estimate=cost,
    )(x, w1, b1, w2, b2, w3, b3)

    if return_transposed:
        return oT            # [3, B] lane-dense; fuse the transpose into the consumer.
    return oT.T              # [B, 3], drop-in PyTorch-module semantics.


def init_params(key):
    """PyTorch-native init: W [out, in], b [out], uniform +/- 1/sqrt(fan_in)."""
    def linear(k, fan_in, fan_out):
        kw, kb = jax.random.split(k)
        bound = 1.0 / jnp.sqrt(fan_in)
        w = jax.random.uniform(kw, (fan_out, fan_in), jnp.float32, -bound, bound)
        b = jax.random.uniform(kb, (fan_out,), jnp.float32, -bound, bound)
        return w, b

    k1, k2, k3 = jax.random.split(key, 3)
    w1, b1 = linear(k1, 4, 32)
    w2, b2 = linear(k2, 32, 32)
    w3, b3 = linear(k3, 32, 3)
    return {"w1": w1, "b1": b1, "w2": w2, "b2": b2, "w3": w3, "b3": b3}


def _reference_forward(x, p):
    h1 = jnp.maximum(x @ p["w1"].T + p["b1"], 0.0)
    h2 = jnp.maximum(h1 @ p["w2"].T + p["b2"], 0.0)
    return h2 @ p["w3"].T + p["b3"]


if __name__ == "__main__":
    key = jax.random.PRNGKey(0)
    kx1, kx2, kx3, kp = jax.random.split(key, 4)
    params = init_params(kp)

    # 1) Tiny batch of (s, s') pairs -> single full-array block, grid=(1,).
    x1 = jax.random.normal(kx1, (8, 4), dtype=jnp.float32)
    out1 = jax.block_until_ready(inv_dynamics_forward(x1, params))
    ref1 = _reference_forward(x1, params)
    assert out1.shape == (8, 3)
    assert jnp.allclose(out1, ref1, atol=1e-4, rtol=1e-4)

    # 2) Ragged batch within one chunk (non-multiple-of-8 full-array block).
    x2 = jax.random.normal(kx2, (300, 4), dtype=jnp.float32)
    out2 = jax.block_until_ready(inv_dynamics_forward(x2, params))
    ref2 = _reference_forward(x2, params)
    assert out2.shape == (300, 3)
    assert jnp.allclose(out2, ref2, atol=1e-4, rtol=1e-4)

    # 3) Multi-step grid + unrolled inner chunk loop + partial final block and
    #    partial final chunk; lane-dense [3, B] output (no wrapper transpose).
    x3 = jax.random.normal(kx3, (1200, 4), dtype=jnp.float32)
    out3T = jax.block_until_ready(
        inv_dynamics_forward(x3, params, return_transposed=True))
    ref3 = _reference_forward(x3, params)
    assert out3T.shape == (3, 1200)
    assert jnp.allclose(out3T, ref3.T, atol=1e-4, rtol=1e-4)

    # 4) bf16 MXU-operand path (cast fused into x's producer here); compared
    #    against the f32 reference with a bf16-appropriate tolerance.
    x3_bf16 = x3.astype(jnp.bfloat16)
    out4 = jax.block_until_ready(inv_dynamics_forward(x3_bf16, params))
    assert out4.shape == (1200, 3)
    assert jnp.allclose(out4, ref3, atol=3e-2, rtol=3e-2)

    print("KERNEL_OK")
</pallas_src>

<mosaic_0001>
module attributes {stable_mosaic.version = 11 : i64} {
  func.func @kernel(%arg0: i32, %arg1: memref<8x4xf32, #tpu.memory_space<vmem>>, %arg2: memref<32x4xf32, #tpu.memory_space<vmem>>, %arg3: memref<32x1xf32, #tpu.memory_space<vmem>>, %arg4: memref<32x32xf32, #tpu.memory_space<vmem>>, %arg5: memref<32x1xf32, #tpu.memory_space<vmem>>, %arg6: memref<3x32xf32, #tpu.memory_space<vmem>>, %arg7: memref<3x1xf32, #tpu.memory_space<vmem>>, %arg8: memref<3x8xf32, #tpu.memory_space<vmem>>) attributes {dimension_semantics = [#tpu.dimension_semantics<parallel>], iteration_bounds = array<i64: 1>, scalar_prefetch = 0 : i64, scratch_operands = 0 : i64, tpu.core_type = #tpu.core_type<tc>, window_params = [{transform_indices = @transform_0, window_bounds = array<i64: 8, 4>}, {pipeline_mode = #tpu.pipeline_mode<synchronous>, transform_indices = @transform_1, window_bounds = array<i64: 32, 4>}, {pipeline_mode = #tpu.pipeline_mode<synchronous>, transform_indices = @transform_2, window_bounds = array<i64: 32, 1>}, {pipeline_mode = #tpu.pipeline_mode<synchronous>, transform_indices = @transform_3, window_bounds = array<i64: 32, 32>}, {pipeline_mode = #tpu.pipeline_mode<synchronous>, transform_indices = @transform_4, window_bounds = array<i64: 32, 1>}, {pipeline_mode = #tpu.pipeline_mode<synchronous>, transform_indices = @transform_5, window_bounds = array<i64: 3, 32>}, {pipeline_mode = #tpu.pipeline_mode<synchronous>, transform_indices = @transform_6, window_bounds = array<i64: 3, 1>}, {transform_indices = @transform_7, window_bounds = array<i64: 3, 8>}]} {
    %c0 = arith.constant 0 : index
    %c0_0 = arith.constant 0 : index
    %0 = vector.load %arg1[%c0, %c0_0] : memref<8x4xf32, #tpu.memory_space<vmem>>, vector<8x4xf32>
    %c0_1 = arith.constant 0 : index
    %c0_2 = arith.constant 0 : index
    %1 = vector.load %arg2[%c0_1, %c0_2] : memref<32x4xf32, #tpu.memory_space<vmem>>, vector<32x4xf32>
    %cst = arith.constant dense<0.000000e+00> : vector<32x8xf32>
    %2 = tpu.matmul %1, %0, %cst {dimension_numbers = #tpu.dot_dimension_numbers<[1], [1], [0], [0], [0, 0, 1, 0], [], []>} : vector<32x4xf32>, vector<8x4xf32>, vector<32x8xf32> -> vector<32x8xf32>
    %c0_3 = arith.constant 0 : index
    %c0_4 = arith.constant 0 : index
    %3 = vector.load %arg3[%c0_3, %c0_4] : memref<32x1xf32, #tpu.memory_space<vmem>>, vector<32x1xf32>
    %4 = vector.broadcast %3 : vector<32x1xf32> to vector<32x8xf32>
    %5 = arith.addf %2, %4 : vector<32x8xf32>
    %cst_5 = arith.constant 0.000000e+00 : f32
    %6 = vector.broadcast %cst_5 : f32 to vector<32x8xf32>
    %7 = arith.maximumf %5, %6 : vector<32x8xf32>
    %c0_6 = arith.constant 0 : index
    %c0_7 = arith.constant 0 : index
    %8 = vector.load %arg4[%c0_6, %c0_7] : memref<32x32xf32, #tpu.memory_space<vmem>>, vector<32x32xf32>
    %cst_8 = arith.constant dense<0.000000e+00> : vector<32x8xf32>
    %9 = tpu.matmul %8, %7, %cst_8 {dimension_numbers = #tpu.dot_dimension_numbers<[1], [0], [0], [1], [0, 0, 1, 1], [], []>} : vector<32x32xf32>, vector<32x8xf32>, vector<32x8xf32> -> vector<32x8xf32>
    %c0_9 = arith.constant 0 : index
    %c0_10 = arith.constant 0 : index
    %10 = vector.load %arg5[%c0_9, %c0_10] : memref<32x1xf32, #tpu.memory_space<vmem>>, vector<32x1xf32>
    %11 = vector.broadcast %10 : vector<32x1xf32> to vector<32x8xf32>
    %12 = arith.addf %9, %11 : vector<32x8xf32>
    %cst_11 = arith.constant 0.000000e+00 : f32
    %13 = vector.broadcast %cst_11 : f32 to vector<32x8xf32>
    %14 = arith.maximumf %12, %13 : vector<32x8xf32>
    %c0_12 = arith.constant 0 : index
    %c0_13 = arith.constant 0 : index
    %15 = vector.load %arg6[%c0_12, %c0_13] : memref<3x32xf32, #tpu.memory_space<vmem>>, vector<3x32xf32>
    %cst_14 = arith.constant dense<0.000000e+00> : vector<3x8xf32>
    %16 = tpu.matmul %15, %14, %cst_14 {dimension_numbers = #tpu.dot_dimension_numbers<[1], [0], [0], [1], [0, 0, 1, 1], [], []>} : vector<3x32xf32>, vector<32x8xf32>, vector<3x8xf32> -> vector<3x8xf32>
    %c0_15 = arith.constant 0 : index
    %c0_16 = arith.constant 0 : index
    %17 = vector.load %arg7[%c0_15, %c0_16] : memref<3x1xf32, #tpu.memory_space<vmem>>, vector<3x1xf32>
    %18 = vector.broadcast %17 : vector<3x1xf32> to vector<3x8xf32>
    %19 = arith.addf %16, %18 : vector<3x8xf32>
    %c0_17 = arith.constant 0 : index
    %c0_18 = arith.constant 0 : index
    %20 = vector.load %arg8[%c0_17, %c0_18] : memref<3x8xf32, #tpu.memory_space<vmem>>, vector<3x8xf32>
    tpu.vector_store %arg8[%c0_17, %c0_18], %19 {strides = array<i32>} : memref<3x8xf32, #tpu.memory_space<vmem>>, vector<3x8xf32>,
    return
  }
  func.func @transform_0(%arg0: i32) -> (i32, i32) {
    %c0_i32 = arith.constant 0 : i32
    %c0_i32_0 = arith.constant 0 : i32
    return %arg0, %c0_i32 : i32, i32
  }
  func.func @transform_1(%arg0: i32) -> (i32, i32) {
    %c0_i32 = arith.constant 0 : i32
    %c0_i32_0 = arith.constant 0 : i32
    %c0_i32_1 = arith.constant 0 : i32
    return %c0_i32, %c0_i32_0 : i32, i32
  }
  func.func @transform_2(%arg0: i32) -> (i32, i32) {
    %c0_i32 = arith.constant 0 : i32
    %c0_i32_0 = arith.constant 0 : i32
    %c0_i32_1 = arith.constant 0 : i32
    return %c0_i32, %c0_i32_0 : i32, i32
  }
  func.func @transform_3(%arg0: i32) -> (i32, i32) {
    %c0_i32 = arith.constant 0 : i32
    %c0_i32_0 = arith.constant 0 : i32
    %c0_i32_1 = arith.constant 0 : i32
    return %c0_i32, %c0_i32_0 : i32, i32
  }
  func.func @transform_4(%arg0: i32) -> (i32, i32) {
    %c0_i32 = arith.constant 0 : i32
    %c0_i32_0 = arith.constant 0 : i32
    %c0_i32_1 = arith.constant 0 : i32
    return %c0_i32, %c0_i32_0 : i32, i32
  }
  func.func @transform_5(%arg0: i32) -> (i32, i32) {
    %c0_i32 = arith.constant 0 : i32
    %c0_i32_0 = arith.constant 0 : i32
    %c0_i32_1 = arith.constant 0 : i32
    return %c0_i32, %c0_i32_0 : i32, i32
  }
  func.func @transform_6(%arg0: i32) -> (i32, i32) {
    %c0_i32 = arith.constant 0 : i32
    %c0_i32_0 = arith.constant 0 : i32
    %c0_i32_1 = arith.constant 0 : i32
    return %c0_i32, %c0_i32_0 : i32, i32
  }
  func.func @transform_7(%arg0: i32) -> (i32, i32) {
    %c0_i32 = arith.constant 0 : i32
    %c0_i32_0 = arith.constant 0 : i32
    return %c0_i32, %arg0 : i32, i32
  }
}

</mosaic_0001>

<bundles_post_ra>
// kernel: tpu_custom_call.1
= control target key start
LH: loop header
LB: loop body
LE: loop exit
PB: predicated region body
PF: predicated region fallthrough
CT: control target
= control target key end

     0   :  { %vm56_vm0 = vcmask 31744   ;;  %v277_v3 = vmov 0   ;;  %s390_s0 = inlined_call_operand.vmem [shape: f32[8,4], index: 0, kind: input, shape index: {}]   ;;  %s391_s1 = inlined_call_operand.vmem [shape: f32[32,4], index: 1, kind: input, shape index: {}]   ;;  %s392_s2 = inlined_call_operand.vmem [shape: f32[32,1], index: 2, kind: input, shape index: {}]   ;;  %s393_s3 = inlined_call_operand.vmem [shape: f32[32,32], index: 3, kind: input, shape index: {}]   ;;  %s394_s4 = inlined_call_operand.vmem [shape: f32[32,1], index: 4, kind: input, shape index: {}]   ;;  %s395_s5 = inlined_call_operand.vmem [shape: f32[3,32], index: 5, kind: input, shape index: {}]   ;;  %s396_s6 = inlined_call_operand.vmem [shape: f32[3,1], index: 6, kind: input, shape index: {}]   ;;  %s397_s7 = inlined_call_operand.hbm [shape: f32[3,8], index: 7, kind: output, shape index: {}]  }
   0x1   :  { %v27_v0 = vld [vmem:[%s390_s0] sm:$0xff]  ;;  %v35_v1 = vld [vmem:[%s392_s2 + $0x18] sm:$0xff]  ;;  %249 = vset.pattern.permute.xlu1 %v277_v3  ;;  %v33_v4 = vld [vmem:[%s392_s2 + $0x8] sm:$0xff]  ;;  %248 = vset.pattern.permute.xlu0 %v277_v3 }
   0x2   :  { %227 = vmatpush.xpose.msk.msra.mxu0 %vm56_vm0, %v27_v0  ;;  %v28_v2 = vld [vmem:[%s391_s1] sm:$0xff]  ;;  %43 = vperm.xlu1 %249, %v33_v4   ;;  %v31_v5 = vld [vmem:[%s391_s1 + $0x18] sm:$0xff] }
   0x3   :  { %53 = vperm.xlu0 %248, %v35_v1   ;;  %237 = vmatpush.xpose.msk.msra.mxu1 %vm56_vm0, %v27_v0 }
   0x4   :  { %12 = vsyncpa [#allocation3], 0  ;;  %250 = vset.pattern.permute.xlu2 %v277_v3  ;;  %v32_v6 = vld [vmem:[%s392_s2] sm:$0xff]  ;;  %v34_v7 = vld [vmem:[%s392_s2 + $0x10] sm:$0xff]  ;;  %vm133_vm1 = vcmask 261120   ;;  %s278_s9 = smov [#allocation2]  }
   0x5   :  { %228 = vmatmul.msk.f32.vlgmr.msra.gmra.mxu0 %vm56_vm0, %v28_v2  ;;  %v29_v8 = vld [vmem:[%s391_s1 + $0x8] sm:$0xff]  ;;  %v109_v9 = vld [vmem:[%s394_s4] sm:$0xff]  ;;  %v30_v11 = vld [vmem:[%s391_s1 + $0x10] sm:$0xff]  ;;  %s216_s10 = sshll.u32 %s278_s9, 4  ;;  %s218_s13 = sshll.u32 %s397_s7, 4  ;;  %vm209_vm2 = vcmask 59392   ;;  %s217_s10 = int_to_ptr.vmem [resolvable:$true] %s216_s10  ;;  %s219_s13 = int_to_ptr.hbm [resolvable:$true] %s218_s13 }
   0x6   :  { %231 = vmatmul.msk.f32.vlgmr.msra.gmra.mxu1 %vm56_vm0, %v31_v5  ;;  %v110_v10 = vld [vmem:[%s394_s4 + $0x8] sm:$0xff]  ;;  %v112_v16 = vld [vmem:[%s394_s4 + $0x18] sm:$0xff]  ;;  %v111_v20 = vld [vmem:[%s394_s4 + $0x10] sm:$0xff] }
   0x7   :  { %130 = vperm.xlu2 %250, %v112_v16   ;;  %v180_v26 = vld [vmem:[%s396_s6] sm:$0x7]  ;;  %v106_v32 = vld [vmem:[%s393_s3 + $0x8] sm:$0xff]  ;;  %v107_v33 = vld [vmem:[%s393_s3 + $0x10] sm:$0xff] }
   0x8   :  { %v105_v31 = vld [vmem:[%s393_s3] sm:$0xff]  ;;  %v108_v34 = vld [vmem:[%s393_s3 + $0x18] sm:$0xff] }
   0x9   :  { %v179_v51 = vld [vmem:[%s395_s5] sm:$0x7] }
   0xa   :  { %38 = vperm.xlu1 %249, %v32_v6  }
   0xb   :  { %48 = vperm.xlu0 %248, %v34_v7  }
   0xd   :  { %229 = vmatmul.msk.f32.gmra.mxu0 %vm56_vm0, %v29_v8 }
   0xf   :  { %125 = vperm.xlu2 %250, %v111_v20  }
  0x12   :  { %115 = vperm.xlu1 %249, %v109_v9  }
  0x13   :  { %120 = vperm.xlu0 %248, %v110_v10  }
  0x15   :  { %230 = vmatmul.msk.f32.gmra.mxu0 %vm56_vm0, %v30_v11 }
  0x17   :  { %183 = vperm.xlu2 %250, %v180_v26  }
  0x61   :  { %v131_v35 = vpop.permute.xlu2 %130 }
  0x69   :  { %v126_v37 = vpop.permute.xlu2 %125 }
  0x71   :  { %v184_v52 = vpop.permute.xlu2 %183 }
  0x74   :  { %v44_v17 = vpop.permute.xlu1 %43 }
  0x75   :  { %v54_v13 = vpop.permute.xlu0 %53 }
  0x7c   :  { %v39_v21 = vpop.permute.xlu1 %38 }
  0x7d   :  { %v49_v22 = vpop.permute.xlu0 %48 }
  0x82   :  { %v89_v12 = vpop.f32.mrf.mxu0 }
  0x83   :  { %v98_v14 = vpop.f32.mrf.mxu1  ;;  %v90_v27 = vadd.f32 %v89_v12, %v39_v21 }
  0x84   :  { %v99_v15 = vadd.f32 %v98_v14, %v54_v13  ;;  %v116_v46 = vpop.permute.xlu1 %115 }
  0x85   :  { %v101_v30 = vmax.f32 %v90_v27, 0.0  ;;  %v121_v42 = vpop.permute.xlu0 %120 }
  0x86   :  { %v104_v18 = vmax.f32 %v99_v15, 0.0 }
  0x88   :  { %158 = vmatpush.msrb.mxu1 %v104_v18  ;;  %238 = vmatpush.msra.mxu2 %v104_v18 }
  0x89   :  { %239 = vmatpush.msra.mxu3 %v104_v18 }
  0x8a   :  { %v92_v19 = vpop.f32.mrf.mxu0 }
  0x8b   :  { %v93_v24 = vadd.f32 %v92_v19, %v44_v17 }
  0x8d   :  { %v102_v29 = vmax.f32 %v93_v24, 0.0 }
  0x92   :  { %v95_v23 = vpop.f32.mrf.mxu0 }
  0x93   :  { %v96_v25 = vadd.f32 %v95_v23, %v49_v22 }
  0x95   :  { %v103_v28 = vmax.f32 %v96_v25, 0.0 }
  0x97   :  { %159 = vmatpush.msrb.mxu1 %v103_v28  ;;  %240 = vmatpush.msra.mxu2 %v103_v28 }
  0x98   :  { %241 = vmatpush.msra.mxu3 %v103_v28 }
  0x99   :  { %160 = vmatpush.msrb.mxu1 %v102_v29  ;;  %242 = vmatpush.msra.mxu2 %v102_v29 }
  0x9a   :  { %243 = vmatpush.msra.mxu3 %v102_v29 }
  0x9b   :  { %161 = vmatpush.msrb.mxu1 %v101_v30  ;;  %244 = vmatpush.msra.mxu2 %v101_v30 }
  0x9c   :  { %245 = vmatpush.msra.mxu3 %v101_v30  ;;  %232 = vmatmul.msk.f32.vlgmr.msrb.gmra.mxu1 %vm133_vm1, %v105_v31 }
  0x9d   :  { %233 = vmatmul.msk.f32.vlgmr.msra.gmra.mxu2 %vm133_vm1, %v106_v32  ;;  %234 = vmatmul.msk.f32.vlgmr.msra.gmra.mxu3 %vm133_vm1, %v107_v33 }
  0xa5   :  { %235 = vmatmul.msk.f32.gmra.mxu3 %vm133_vm1, %v108_v34 }
 0x119   :  { %v163_v43 = vpop.f32.mrf.mxu1 }
 0x11a   :  { %v164_v47 = vadd.f32 %v163_v43, %v116_v46 }
 0x11c   :  { %v175_v50 = vmax.f32 %v164_v47, 0.0 }
 0x120   :  { %v169_v36 = vpop.f32.mrf.mxu3  ;;  %v166_v38 = vpop.f32.mrf.mxu2 }
 0x121   :  { %v170_v40 = vadd.f32 %v169_v36, %v126_v37  ;;  %v167_v44 = vadd.f32 %v166_v38, %v121_v42 }
 0x123   :  { %v177_v48 = vmax.f32 %v170_v40, 0.0  ;;  %v176_v49 = vmax.f32 %v167_v44, 0.0 }
 0x128   :  { %v172_v39 = vpop.f32.mrf.mxu3 }
 0x129   :  { %v173_v41 = vadd.f32 %v172_v39, %v131_v35 }
 0x12b   :  { %v178_v45 = vmax.f32 %v173_v41, 0.0 }
 0x12d   :  { %201 = vmatpush.msrb.mxu2 %v178_v45 }
 0x12f   :  { %202 = vmatpush.msrb.mxu2 %v177_v48 }
 0x131   :  { %203 = vmatpush.msrb.mxu2 %v176_v49 }
 0x133   :  { %204 = vmatpush.msrb.mxu2 %v175_v50 }
 0x134   :  { %236 = vmatmul.msk.f32.vlgmr.msrb.gmra.mxu2 %vm133_vm1, %v179_v51 }
 0x1b7   :  { %v206_v53 = vpop.f32.mrf.mxu2 }
 0x1b8   :  { %v207_v54 = vadd.f32 %v206_v53, %v184_v52 }
 0x1ba   :  { %210 = vst.msk [vmem:[#allocation2] sm:$0x7] %vm209_vm2, %v207_v54 }
 0x1bb   :  { %221 = dma.vmem_to_hbm [thread:$0]  %s217_s10, 64, %s219_s13, [#allocation3]  }
 0x1bc   :  { %275 = dma.done.wait [#allocation3], 64  }
 0x1bd   :  { %276 = vsyncadd [#allocation3], 4294967232 }
 0x1be   :  { %226 = vsyncpa [#allocation3], 1 }

</bundles_post_ra>
